<compile_context>
chip_gen: v7x
topology: tpu7x:2x2x1
jax: 0.10.0
libtpu: 0.0.40
codegen_flags: <defaults>
</compile_context>

<pallas_src>
import numpy as np
import jax
import jax.numpy as jnp
from jax.experimental import pallas as pl
from jax.experimental.pallas import tpu as pltpu

# ------------------------- problem sizes (small) -------------------------
B_GRAPHS = 4
N_NODES = 16
INPUT_DIM = 16          # equals N_NODES so A' and X stack into one rectangular block
HIDDEN_DIMS = [32, 32]
Z_DIM = 8
N_EDGES = 40

LEAKY_SLOPE = 0.01
BN_EPS = 1e-5
GIN_EPS = 0.0           # wGINConv eps (train_eps=True, init value 0.0)

OUT_LANES = 128         # lane-dense output width

# --------------------- packed parameter slab layout ---------------------
# Each tensor sits at an 8-aligned row offset inside one [P_ROWS, 128] f32 slab.
def _align8(r):
    return (r + 7) // 8 * 8

_LAYOUT = {}
_row = 0
for _name, _shape in [
    ("g0w1", (INPUT_DIM, 16)), ("g0b1", (1, 16)),
    ("g0w2", (16, HIDDEN_DIMS[0])), ("g0b2", (1, HIDDEN_DIMS[0])),
    ("g1w1", (HIDDEN_DIMS[0], 32)), ("g1b1", (1, 32)),
    ("g1w2", (32, HIDDEN_DIMS[1])), ("g1b2", (1, HIDDEN_DIMS[1])),
    ("linw", (sum(HIDDEN_DIMS), OUT_LANES)), ("linb", (1, OUT_LANES)),
]:
    _LAYOUT[_name] = (_row, _shape)
    _row = _align8(_row + _shape[0])
P_ROWS = _align8(_row)          # 200 rows -> [200,128] f32 slab (~100 KB)


def _pslice(p_ref, name):
    r, (h, w) = _LAYOUT[name]
    return p_ref[r:r + h, 0:w]      # static slice of the VMEM ref view


# ------------------------------ Pallas kernel ------------------------------
def _leaky(x):
    return jnp.where(x >= 0, x, LEAKY_SLOPE * x)


def _bn_normalize(x):
    # training-mode BatchNorm1d over the node axis (biased variance);
    # the affine gamma/beta are folded into the neighboring Linear weights.
    mu = jnp.mean(x, axis=0, keepdims=True)
    var = jnp.mean((x - mu) ** 2, axis=0, keepdims=True)
    return (x - mu) * jax.lax.rsqrt(var + BN_EPS)


def gnn_kernel(ax_ref, p_ref, out_ref):
    # ax block layout: rows 0:N   = A' = A + (1+eps)*I  (GIN self-term folded in)
    #                  rows N:2N  = X  (node features)
    A = ax_ref[0:N_NODES, :]                       # [N, N]
    X = ax_ref[N_NODES:2 * N_NODES, :]             # [N, INPUT_DIM]

    def gin(x_in, w1, b1, w2, b2):
        agg = jnp.dot(A, x_in, preferred_element_type=jnp.float32)      # (1+eps)x + A@x
        z = jnp.dot(agg, w1, preferred_element_type=jnp.float32) + b1
        z = _bn_normalize(_leaky(z))                                     # affine folded into w2/b2
        return jnp.dot(z, w2, preferred_element_type=jnp.float32) + b2

    # ---- GIN layer 0 (raw output h0 is what gets concatenated) ----
    h0 = gin(X,
             _pslice(p_ref, "g0w1"), _pslice(p_ref, "g0b1"),
             _pslice(p_ref, "g0w2"), _pslice(p_ref, "g0b2"))             # [N, 32]

    # ---- inter-layer LeakyReLU + BatchNorm + Dropout(0) ----
    # bn0 gamma is folded into g1w1; bn0 beta is 0 for a fresh BatchNorm1d
    # (general beta would need a per-node rowsum(A') correction term).
    t = _bn_normalize(_leaky(h0))                                        # [N, 32]

    # ---- GIN layer 1 ----
    h1 = gin(t,
             _pslice(p_ref, "g1w1"), _pslice(p_ref, "g1b1"),
             _pslice(p_ref, "g1w2"), _pslice(p_ref, "g1b2"))             # [N, 32]
    # (trailing LeakyReLU/BN/Dropout in GNNLayers never feed the output:
    #  hidden_concat uses the raw GIN outputs, so they are skipped.)

    # ---- concat + global_add_pool + final Linear, as one value/reduce/matmul ----
    h = jnp.concatenate([h0, h1], axis=-1)                               # [N, 64]
    pooled = jnp.sum(h, axis=0, keepdims=True)                           # [1, 64]
    out = jnp.dot(pooled, _pslice(p_ref, "linw"),
                  preferred_element_type=jnp.float32) + _pslice(p_ref, "linb")  # [1, 128]
    out_ref[...] = jnp.broadcast_to(out, (8, OUT_LANES))                 # lane-dense store


def gnn_encoder_forward(ax_slab, param_slab):
    b = ax_slab.shape[0]
    return pl.pallas_call(
        gnn_kernel,
        out_shape=jax.ShapeDtypeStruct((b, 8, OUT_LANES), jnp.float32),
        grid=(b,),
        in_specs=[
            pl.BlockSpec((None, 2 * N_NODES, N_NODES), lambda i: (i, 0, 0)),
            pl.BlockSpec((P_ROWS, 128), lambda i: (0, 0)),   # same block every step
        ],
        out_specs=pl.BlockSpec((None, 8, OUT_LANES), lambda i: (i, 0, 0)),
        compiler_params=pltpu.CompilerParams(dimension_semantics=("parallel",)),
    )(ax_slab, param_slab)


# --------------------- one-time parameter fold / pack ---------------------
def fold_params(params):
    (g0w1, g0b1, g0g, g0bt, g0w2, g0b2,
     bn0g, bn0b,
     g1w1, g1b1, g1g, g1bt, g1w2, g1b2,
     linw, linb) = [np.asarray(p, np.float32) for p in params]

    # MLP-internal BN affine folds exactly into the following Linear:
    #   (nrm*g + bt) @ W2 + b2  ==  nrm @ (diag(g) W2) + (bt @ W2 + b2)
    g0w2f = g0g.reshape(-1, 1) * g0w2
    g0b2f = g0b2 + g0bt @ g0w2
    g1w2f = g1g.reshape(-1, 1) * g1w2
    g1b2f = g1b2 + g1bt @ g1w2

    # Inter-layer BN: gamma commutes through the linear GIN aggregation, so it
    # folds into g1w1.  beta is 0 for a fresh nn.BatchNorm1d; a general beta
    # would require a per-node rowsum(A') correction term.
    assert np.all(bn0b == 0.0), "general bn0 beta needs a rowsum(A') correction"
    g1w1f = bn0g.reshape(-1, 1) * g1w1
    g1b1f = g1b1

    # final Linear padded to 128 output lanes (lane-dense store, zeros elsewhere)
    linw_pad = np.zeros((sum(HIDDEN_DIMS), OUT_LANES), np.float32)
    linw_pad[:, :Z_DIM] = linw
    linb_pad = np.zeros((1, OUT_LANES), np.float32)
    linb_pad[:, :Z_DIM] = linb

    return {"g0w1": g0w1, "g0b1": g0b1, "g0w2": g0w2f, "g0b2": g0b2f,
            "g1w1": g1w1f, "g1b1": g1b1f, "g1w2": g1w2f, "g1b2": g1b2f,
            "linw": linw_pad, "linb": linb_pad}


def pack_params(folded):
    slab = np.zeros((P_ROWS, 128), np.float32)
    for name, arr in folded.items():
        r, (h, w) = _LAYOUT[name]
        assert arr.shape[0] == h and arr.shape[1] <= w
        slab[r:r + h, 0:arr.shape[1]] = arr
    return jnp.asarray(slab)


def pack_graphs(A_batch, X_batch):
    # Fold the GIN self term (1+eps)*I into the adjacency and stack A' over X
    # along sublanes so each graph is a single rectangular DMA block.
    a_prime = A_batch + (1.0 + GIN_EPS) * jnp.eye(N_NODES, dtype=jnp.float32)[None]
    return jnp.concatenate([a_prime, X_batch], axis=1)          # [B, 2N, N]


# ------------------------------ pure-JAX reference ------------------------------
def reference_forward(A, X, params):
    """Unfolded per-graph reference matching the PyTorch module semantics."""
    (g0w1, g0b1, g0g, g0bt, g0w2, g0b2,
     bn0g, bn0b,
     g1w1, g1b1, g1g, g1bt, g1w2, g1b2,
     linw, linb) = params

    def leaky(x):
        return jnp.where(x >= 0, x, LEAKY_SLOPE * x)

    def bn(x, g, b):
        mu = jnp.mean(x, axis=0, keepdims=True)
        var = jnp.mean((x - mu) ** 2, axis=0, keepdims=True)
        return (x - mu) / jnp.sqrt(var + BN_EPS) * g + b

    def gin(x, w1, b1, g, bt, w2, b2):
        agg = (1.0 + GIN_EPS) * x + A @ x
        z = bn(leaky(agg @ w1 + b1), g, bt)
        return z @ w2 + b2

    h0 = gin(X, g0w1, g0b1, g0g, g0bt, g0w2, g0b2)
    t = bn(leaky(h0), bn0g, bn0b)
    h1 = gin(t, g1w1, g1b1, g1g, g1bt, g1w2, g1b2)
    h = jnp.concatenate([h0, h1], axis=-1)
    pooled = jnp.sum(h, axis=0, keepdims=True)
    return pooled @ linw + linb


# ------------------------------ parameter init ------------------------------
def linear_init(key, fan_in, fan_out):
    kw, kb = jax.random.split(key)
    bound = 1.0 / np.sqrt(fan_in)
    w = jax.random.uniform(kw, (fan_in, fan_out), jnp.float32, -bound, bound)
    b = jax.random.uniform(kb, (1, fan_out), jnp.float32, -bound, bound)
    return w, b


def make_params(key):
    ks = jax.random.split(key, 8)
    # GIN layer 0 MLP: hidden_dim = min(16, 32) = 16
    g0w1, g0b1 = linear_init(ks[0], INPUT_DIM, 16)
    g0g, g0bt = jnp.ones((1, 16), jnp.float32), jnp.zeros((1, 16), jnp.float32)
    g0w2, g0b2 = linear_init(ks[1], 16, HIDDEN_DIMS[0])
    # between-layer BN(32)
    bn0g, bn0b = jnp.ones((1, 32), jnp.float32), jnp.zeros((1, 32), jnp.float32)
    # GIN layer 1 MLP: hidden_dim = min(32, 32) = 32
    g1w1, g1b1 = linear_init(ks[2], HIDDEN_DIMS[0], 32)
    g1g, g1bt = jnp.ones((1, 32), jnp.float32), jnp.zeros((1, 32), jnp.float32)
    g1w2, g1b2 = linear_init(ks[3], 32, HIDDEN_DIMS[1])
    # final linear: sum(hidden_dims)=64 -> z_dim=8
    linw, linb = linear_init(ks[4], sum(HIDDEN_DIMS), Z_DIM)
    return (g0w1, g0b1, g0g, g0bt, g0w2, g0b2,
            bn0g, bn0b,
            g1w1, g1b1, g1g, g1bt, g1w2, g1b2,
            linw, linb)


# ------------------------------ main ------------------------------
if __name__ == "__main__":
    key = jax.random.PRNGKey(0)
    k_x, k_src, k_dst, k_w, k_p = jax.random.split(key, 5)

    # B independent graphs: node features + weighted edge lists
    X_batch = jax.random.normal(k_x, (B_GRAPHS, N_NODES, INPUT_DIM), jnp.float32)
    src = jax.random.randint(k_src, (B_GRAPHS, N_EDGES), 0, N_NODES)
    dst = jax.random.randint(k_dst, (B_GRAPHS, N_EDGES), 0, N_NODES)
    ew = jax.random.uniform(k_w, (B_GRAPHS, N_EDGES), jnp.float32, 0.1, 1.0)

    # dense weighted adjacency per graph: A[b, dst, src] += w   (wrapper glue)
    bidx = jnp.broadcast_to(jnp.arange(B_GRAPHS)[:, None], (B_GRAPHS, N_EDGES))
    A_batch = jnp.zeros((B_GRAPHS, N_NODES, N_NODES), jnp.float32)
    A_batch = A_batch.at[bidx, dst, src].add(ew)

    params = make_params(k_p)

    # one-time parameter fold + pack, per-call graph packing
    param_slab = pack_params(fold_params(params))
    ax_slab = pack_graphs(A_batch, X_batch)

    out_full = gnn_encoder_forward(ax_slab, param_slab)
    out_full = jax.block_until_ready(out_full)
    out = out_full[:, 0, :Z_DIM]                                  # [B, z_dim]

    ref = jax.vmap(lambda A, X: reference_forward(A, X, params))(A_batch, X_batch)
    ref = ref[:, 0, :]                                            # [B, z_dim]

    np.testing.assert_allclose(np.asarray(out), np.asarray(ref), rtol=1e-4, atol=1e-4)
    assert out.shape == (B_GRAPHS, Z_DIM)
    print("KERNEL_OK")
</pallas_src>

<mosaic_0001>
module attributes {stable_mosaic.version = 11 : i64} {
  func.func @gnn_kernel(%arg0: i32, %arg1: memref<1x32x16xf32, #tpu.memory_space<vmem>>, %arg2: memref<200x128xf32, #tpu.memory_space<vmem>>, %arg3: memref<1x8x128xf32, #tpu.memory_space<vmem>>) attributes {dimension_semantics = [#tpu.dimension_semantics<parallel>], iteration_bounds = array<i64: 4>, scalar_prefetch = 0 : i64, scratch_operands = 0 : i64, tpu.core_type = #tpu.core_type<tc>, window_params = [{transform_indices = @transform_0, window_bounds = array<i64: 1, 32, 16>}, {pipeline_mode = #tpu.pipeline_mode<synchronous>, transform_indices = @transform_1, window_bounds = array<i64: 200, 128>}, {transform_indices = @transform_2, window_bounds = array<i64: 1, 8, 128>}]} {
    %c0 = arith.constant 0 : index
    %c0_0 = arith.constant 0 : index
    %c0_1 = arith.constant 0 : index
    %0 = vector.load %arg1[%c0, %c0_0, %c0_1] : memref<1x32x16xf32, #tpu.memory_space<vmem>>, vector<1x16x16xf32>
    %1 = vector.shape_cast %0 : vector<1x16x16xf32> to vector<16x16xf32>
    %c0_2 = arith.constant 0 : index
    %c16 = arith.constant 16 : index
    %c0_3 = arith.constant 0 : index
    %2 = vector.load %arg1[%c0_2, %c16, %c0_3] : memref<1x32x16xf32, #tpu.memory_space<vmem>>, vector<1x16x16xf32>
    %3 = vector.shape_cast %2 : vector<1x16x16xf32> to vector<16x16xf32>
    %c0_4 = arith.constant 0 : index
    %c0_5 = arith.constant 0 : index
    %4 = vector.load %arg2[%c0_4, %c0_5] : memref<200x128xf32, #tpu.memory_space<vmem>>, vector<16x16xf32>
    %c16_6 = arith.constant 16 : index
    %c0_7 = arith.constant 0 : index
    %5 = vector.load %arg2[%c16_6, %c0_7] : memref<200x128xf32, #tpu.memory_space<vmem>>, vector<1x16xf32>
    %c24 = arith.constant 24 : index
    %c0_8 = arith.constant 0 : index
    %6 = vector.load %arg2[%c24, %c0_8] : memref<200x128xf32, #tpu.memory_space<vmem>>, vector<16x32xf32>
    %c40 = arith.constant 40 : index
    %c0_9 = arith.constant 0 : index
    %7 = vector.load %arg2[%c40, %c0_9] : memref<200x128xf32, #tpu.memory_space<vmem>>, vector<1x32xf32>
    %cst = arith.constant dense<0.000000e+00> : vector<16x16xf32>
    %8 = tpu.matmul %1, %3, %cst {dimension_numbers = #tpu.dot_dimension_numbers<[1], [0], [0], [1], [0, 0, 1, 1], [], []>} : vector<16x16xf32>, vector<16x16xf32>, vector<16x16xf32> -> vector<16x16xf32>
    %cst_10 = arith.constant dense<0.000000e+00> : vector<16x16xf32>
    %9 = tpu.matmul %8, %4, %cst_10 {dimension_numbers = #tpu.dot_dimension_numbers<[1], [0], [0], [1], [0, 0, 1, 1], [], []>} : vector<16x16xf32>, vector<16x16xf32>, vector<16x16xf32> -> vector<16x16xf32>
    %10 = vector.broadcast %5 : vector<1x16xf32> to vector<16x16xf32>
    %11 = arith.addf %9, %10 : vector<16x16xf32>
    %cst_11 = arith.constant 0.000000e+00 : f32
    %12 = vector.broadcast %cst_11 : f32 to vector<16x16xf32>
    %13 = arith.cmpf oge, %11, %12 : vector<16x16xf32>
    %cst_12 = arith.constant 0.00999999977 : f32
    %14 = vector.broadcast %cst_12 : f32 to vector<16x16xf32>
    %15 = arith.mulf %14, %11 : vector<16x16xf32>
    %16 = arith.select %13, %11, %15 : vector<16x16xi1>, vector<16x16xf32>
    %cst_13 = arith.constant dense<0.000000e+00> : vector<16xf32>
    %17 = vector.multi_reduction <add>, %16, %cst_13 [0] : vector<16x16xf32> to vector<16xf32>
    %18 = vector.shape_cast %17 : vector<16xf32> to vector<1x16xf32>
    %cst_14 = arith.constant 1.600000e+01 : f32
    %19 = vector.broadcast %cst_14 : f32 to vector<1x16xf32>
    %20 = arith.divf %18, %19 : vector<1x16xf32>
    %21 = vector.broadcast %20 : vector<1x16xf32> to vector<16x16xf32>
    %22 = arith.subf %16, %21 : vector<16x16xf32>
    %23 = arith.mulf %22, %22 : vector<16x16xf32>
    %cst_15 = arith.constant dense<0.000000e+00> : vector<16xf32>
    %24 = vector.multi_reduction <add>, %23, %cst_15 [0] : vector<16x16xf32> to vector<16xf32>
    %25 = vector.shape_cast %24 : vector<16xf32> to vector<1x16xf32>
    %cst_16 = arith.constant 1.600000e+01 : f32
    %26 = vector.broadcast %cst_16 : f32 to vector<1x16xf32>
    %27 = arith.divf %25, %26 : vector<1x16xf32>
    %28 = vector.broadcast %20 : vector<1x16xf32> to vector<16x16xf32>
    %29 = arith.subf %16, %28 : vector<16x16xf32>
    %cst_17 = arith.constant 9.99999974E-6 : f32
    %30 = vector.broadcast %cst_17 : f32 to vector<1x16xf32>
    %31 = arith.addf %27, %30 : vector<1x16xf32>
    %32 = math.rsqrt %31 : vector<1x16xf32>
    %33 = vector.broadcast %32 : vector<1x16xf32> to vector<16x16xf32>
    %34 = arith.mulf %29, %33 : vector<16x16xf32>
    %cst_18 = arith.constant dense<0.000000e+00> : vector<16x32xf32>
    %35 = tpu.matmul %34, %6, %cst_18 {dimension_numbers = #tpu.dot_dimension_numbers<[1], [0], [0], [1], [0, 0, 1, 1], [], []>} : vector<16x16xf32>, vector<16x32xf32>, vector<16x32xf32> -> vector<16x32xf32>
    %36 = vector.broadcast %7 : vector<1x32xf32> to vector<16x32xf32>
    %37 = arith.addf %35, %36 : vector<16x32xf32>
    %cst_19 = arith.constant 0.000000e+00 : f32
    %38 = vector.broadcast %cst_19 : f32 to vector<16x32xf32>
    %39 = arith.cmpf oge, %37, %38 : vector<16x32xf32>
    %cst_20 = arith.constant 0.00999999977 : f32
    %40 = vector.broadcast %cst_20 : f32 to vector<16x32xf32>
    %41 = arith.mulf %40, %37 : vector<16x32xf32>
    %42 = arith.select %39, %37, %41 : vector<16x32xi1>, vector<16x32xf32>
    %cst_21 = arith.constant dense<0.000000e+00> : vector<32xf32>
    %43 = vector.multi_reduction <add>, %42, %cst_21 [0] : vector<16x32xf32> to vector<32xf32>
    %44 = vector.shape_cast %43 : vector<32xf32> to vector<1x32xf32>
    %cst_22 = arith.constant 1.600000e+01 : f32
    %45 = vector.broadcast %cst_22 : f32 to vector<1x32xf32>
    %46 = arith.divf %44, %45 : vector<1x32xf32>
    %47 = vector.broadcast %46 : vector<1x32xf32> to vector<16x32xf32>
    %48 = arith.subf %42, %47 : vector<16x32xf32>
    %49 = arith.mulf %48, %48 : vector<16x32xf32>
    %cst_23 = arith.constant dense<0.000000e+00> : vector<32xf32>
    %50 = vector.multi_reduction <add>, %49, %cst_23 [0] : vector<16x32xf32> to vector<32xf32>
    %51 = vector.shape_cast %50 : vector<32xf32> to vector<1x32xf32>
    %cst_24 = arith.constant 1.600000e+01 : f32
    %52 = vector.broadcast %cst_24 : f32 to vector<1x32xf32>
    %53 = arith.divf %51, %52 : vector<1x32xf32>
    %54 = vector.broadcast %46 : vector<1x32xf32> to vector<16x32xf32>
    %55 = arith.subf %42, %54 : vector<16x32xf32>
    %cst_25 = arith.constant 9.99999974E-6 : f32
    %56 = vector.broadcast %cst_25 : f32 to vector<1x32xf32>
    %57 = arith.addf %53, %56 : vector<1x32xf32>
    %58 = math.rsqrt %57 : vector<1x32xf32>
    %59 = vector.broadcast %58 : vector<1x32xf32> to vector<16x32xf32>
    %60 = arith.mulf %55, %59 : vector<16x32xf32>
    %c48 = arith.constant 48 : index
    %c0_26 = arith.constant 0 : index
    %61 = vector.load %arg2[%c48, %c0_26] : memref<200x128xf32, #tpu.memory_space<vmem>>, vector<32x32xf32>
    %c80 = arith.constant 80 : index
    %c0_27 = arith.constant 0 : index
    %62 = vector.load %arg2[%c80, %c0_27] : memref<200x128xf32, #tpu.memory_space<vmem>>, vector<1x32xf32>
    %c88 = arith.constant 88 : index
    %c0_28 = arith.constant 0 : index
    %63 = vector.load %arg2[%c88, %c0_28] : memref<200x128xf32, #tpu.memory_space<vmem>>, vector<32x32xf32>
    %c120 = arith.constant 120 : index
    %c0_29 = arith.constant 0 : index
    %64 = vector.load %arg2[%c120, %c0_29] : memref<200x128xf32, #tpu.memory_space<vmem>>, vector<1x32xf32>
    %cst_30 = arith.constant dense<0.000000e+00> : vector<16x32xf32>
    %65 = tpu.matmul %1, %60, %cst_30 {dimension_numbers = #tpu.dot_dimension_numbers<[1], [0], [0], [1], [0, 0, 1, 1], [], []>} : vector<16x16xf32>, vector<16x32xf32>, vector<16x32xf32> -> vector<16x32xf32>
    %cst_31 = arith.constant dense<0.000000e+00> : vector<16x32xf32>
    %66 = tpu.matmul %65, %61, %cst_31 {dimension_numbers = #tpu.dot_dimension_numbers<[1], [0], [0], [1], [0, 0, 1, 1], [], []>} : vector<16x32xf32>, vector<32x32xf32>, vector<16x32xf32> -> vector<16x32xf32>
    %67 = vector.broadcast %62 : vector<1x32xf32> to vector<16x32xf32>
    %68 = arith.addf %66, %67 : vector<16x32xf32>
    %cst_32 = arith.constant 0.000000e+00 : f32
    %69 = vector.broadcast %cst_32 : f32 to vector<16x32xf32>
    %70 = arith.cmpf oge, %68, %69 : vector<16x32xf32>
    %cst_33 = arith.constant 0.00999999977 : f32
    %71 = vector.broadcast %cst_33 : f32 to vector<16x32xf32>
    %72 = arith.mulf %71, %68 : vector<16x32xf32>
    %73 = arith.select %70, %68, %72 : vector<16x32xi1>, vector<16x32xf32>
    %cst_34 = arith.constant dense<0.000000e+00> : vector<32xf32>
    %74 = vector.multi_reduction <add>, %73, %cst_34 [0] : vector<16x32xf32> to vector<32xf32>
    %75 = vector.shape_cast %74 : vector<32xf32> to vector<1x32xf32>
    %cst_35 = arith.constant 1.600000e+01 : f32
    %76 = vector.broadcast %cst_35 : f32 to vector<1x32xf32>
    %77 = arith.divf %75, %76 : vector<1x32xf32>
    %78 = vector.broadcast %77 : vector<1x32xf32> to vector<16x32xf32>
    %79 = arith.subf %73, %78 : vector<16x32xf32>
    %80 = arith.mulf %79, %79 : vector<16x32xf32>
    %cst_36 = arith.constant dense<0.000000e+00> : vector<32xf32>
    %81 = vector.multi_reduction <add>, %80, %cst_36 [0] : vector<16x32xf32> to vector<32xf32>
    %82 = vector.shape_cast %81 : vector<32xf32> to vector<1x32xf32>
    %cst_37 = arith.constant 1.600000e+01 : f32
    %83 = vector.broadcast %cst_37 : f32 to vector<1x32xf32>
    %84 = arith.divf %82, %83 : vector<1x32xf32>
    %85 = vector.broadcast %77 : vector<1x32xf32> to vector<16x32xf32>
    %86 = arith.subf %73, %85 : vector<16x32xf32>
    %cst_38 = arith.constant 9.99999974E-6 : f32
    %87 = vector.broadcast %cst_38 : f32 to vector<1x32xf32>
    %88 = arith.addf %84, %87 : vector<1x32xf32>
    %89 = math.rsqrt %88 : vector<1x32xf32>
    %90 = vector.broadcast %89 : vector<1x32xf32> to vector<16x32xf32>
    %91 = arith.mulf %86, %90 : vector<16x32xf32>
    %cst_39 = arith.constant dense<0.000000e+00> : vector<16x32xf32>
    %92 = tpu.matmul %91, %63, %cst_39 {dimension_numbers = #tpu.dot_dimension_numbers<[1], [0], [0], [1], [0, 0, 1, 1], [], []>} : vector<16x32xf32>, vector<32x32xf32>, vector<16x32xf32> -> vector<16x32xf32>
    %93 = vector.broadcast %64 : vector<1x32xf32> to vector<16x32xf32>
    %94 = arith.addf %92, %93 : vector<16x32xf32>
    %95 = tpu.concatenate %37, %94 in 1 : vector<16x32xf32>, vector<16x32xf32> -> vector<16x64xf32>
    %cst_40 = arith.constant dense<0.000000e+00> : vector<64xf32>
    %96 = vector.multi_reduction <add>, %95, %cst_40 [0] : vector<16x64xf32> to vector<64xf32>
    %97 = vector.shape_cast %96 : vector<64xf32> to vector<1x64xf32>
    %c128 = arith.constant 128 : index
    %c0_41 = arith.constant 0 : index
    %98 = vector.load %arg2[%c128, %c0_41] : memref<200x128xf32, #tpu.memory_space<vmem>>, vector<64x128xf32>
    %cst_42 = arith.constant dense<0.000000e+00> : vector<1x128xf32>
    %99 = tpu.matmul %97, %98, %cst_42 {dimension_numbers = #tpu.dot_dimension_numbers<[1], [0], [0], [1], [0, 0, 1, 1], [], []>} : vector<1x64xf32>, vector<64x128xf32>, vector<1x128xf32> -> vector<1x128xf32>
    %c192 = arith.constant 192 : index
    %c0_43 = arith.constant 0 : index
    %100 = vector.load %arg2[%c192, %c0_43] : memref<200x128xf32, #tpu.memory_space<vmem>>, vector<1x128xf32>
    %101 = arith.addf %99, %100 : vector<1x128xf32>
    %102 = vector.shape_cast %101 : vector<1x128xf32> to vector<1x128xf32>
    %103 = vector.broadcast %102 : vector<1x128xf32> to vector<8x128xf32>
    %c0_44 = arith.constant 0 : index
    %c0_45 = arith.constant 0 : index
    %c0_46 = arith.constant 0 : index
    %104 = vector.load %arg3[%c0_44, %c0_45, %c0_46] : memref<1x8x128xf32, #tpu.memory_space<vmem>>, vector<1x8x128xf32>
    %105 = vector.shape_cast %104 : vector<1x8x128xf32> to vector<8x128xf32>
    %106 = vector.shape_cast %103 : vector<8x128xf32> to vector<1x8x128xf32>
    tpu.vector_store %arg3[%c0_44, %c0_45, %c0_46], %106 {strides = array<i32>} : memref<1x8x128xf32, #tpu.memory_space<vmem>>, vector<1x8x128xf32>,
    return
  }
  func.func @transform_0(%arg0: i32) -> (i32, i32, i32) {
    %c0_i32 = arith.constant 0 : i32
    %c0_i32_0 = arith.constant 0 : i32
    %c0_i32_1 = arith.constant 0 : i32
    return %arg0, %c0_i32, %c0_i32_0 : i32, i32, i32
  }
  func.func @transform_1(%arg0: i32) -> (i32, i32) {
    %c0_i32 = arith.constant 0 : i32
    %c0_i32_0 = arith.constant 0 : i32
    %c0_i32_1 = arith.constant 0 : i32
    return %c0_i32, %c0_i32_0 : i32, i32
  }
  func.func @transform_2(%arg0: i32) -> (i32, i32, i32) {
    %c0_i32 = arith.constant 0 : i32
    %c0_i32_0 = arith.constant 0 : i32
    %c0_i32_1 = arith.constant 0 : i32
    return %arg0, %c0_i32, %c0_i32_0 : i32, i32, i32
  }
}

</mosaic_0001>

<bundles_post_ra>
// kernel: tpu_custom_call.1
= control target key start
LH: loop header
LB: loop body
LE: loop exit
PB: predicated region body
PF: predicated region fallthrough
CT: control target
= control target key end

     0   :  { %7 = vsyncpa [#allocation3], 0  ;;  %s1509_s0 = inlined_call_operand.vmem [shape: f32[4,32,16], index: 0, kind: input, shape index: {}]   ;;  %s1510_s1 = inlined_call_operand.hbm [shape: f32[200,128], index: 1, kind: input, shape index: {}]   ;;  %s1511_s2 = inlined_call_operand.hbm [shape: f32[4,8,128], index: 2, kind: output, shape index: {}]  }
   0x1   :  { %8 = vsyncpa [#allocation4], 0 }
   0x2   :  { %10 = vsyncpa [#allocation4 + $0x1], 0  ;;  %s1332_s9 = smov 0   ;;  %s1334_s10 = smov 0  }
   0x3   :  { %s1336_s11 = smov 0   ;;  %s1338_s12 = smov 0  }
   0x4 LB: > { %s1353_s13 = sadd.s32 4294967295, %s1307_s12   ;;  %s970_s14 = sadd.s32 4294967294, %s1307_s12   ;;  %s1307_s12 = sphi %s1338_s12, %s1527_s12   ;;  %s1303_s11 = sphi %s1336_s11, %s1526_s11   ;;  %s1299_s10 = sphi %s1334_s10, %s1525_s10   ;;  %s1295_s9 = sphi %s1332_s9, %s1524_s9  }
   0x5   : > { %s1357_s15 = sadd.s32 1, %s1307_s12   ;;  %s70_s16 = sadd.s32 1, %s1303_s11 }
   0x6   : > { %s67_s17 = ssub.s32 %s1307_s12, %s1357_s15  ;;  %p80_p0 = scmp.ne.s32.totalorder %s1303_s11, %s1299_s10 }
   0x7   : > { %p68_p1 = scmp.eq.s32.totalorder %s67_s17, 0  ;;  %p81_p2 = scmp.eq.s32.totalorder %s1353_s13, 3 }
   0x8   : > { %p86_p3 = scmp.ne.s32.totalorder %s1299_s10, %s1295_s9  ;;  %p87_p4 = scmp.eq.s32.totalorder %s970_s14, 3 }
   0x9   : > { %s1368_s18 = scalar_select %p68_p1, %s1303_s11, %s70_s16  }
   0xa   : > { %p1370_p5 = por %p81_p2, %p80_p0  ;;  %p1374_p6 = por %p87_p4, %p86_p3 }
   0xb   : > { %p971_p7 = scmp.ge.s32.totalorder %s1307_s12, 1  ;;  %p94_p8 = scmp.lt.s32.totalorder %s1307_s12, 5 }
   0xc   : > { %s1515_s19 = scalar_select %p1370_p5, 1, 0 }
   0xd   : > { %s1516_s20 = scalar_select %p1374_p6, 1, 0 }
   0xe   : > { %p1512_p9 = scmp.eq.s32.totalorder %s1353_s13, 0  ;;  %p1381_p10 = pnand %p971_p7, %p94_p8 }
   0xf   : > { %s1309_s22 = smov [#allocation2]   ;;  %s1213_s27 = scalar_lea.hbm %s1510_s1, 3200 }
  0x10   : > { %s1517_s21 = scalar_select %p1381_p10, 1, 0 }
  0x11   : > { %s106_s23 = sshll.u32 %s1309_s22, 4  ;;  %p1157_p11 = pneg %p1381_p10  ;;  %s107_s23 = int_to_ptr.vmem [resolvable:$true] %s106_s23 }
  0x12   : > { %p1214_p13 = scmp.ne.s32.totalorder %s1510_s1, %s1213_s27  ;;  %p1220_p3 = scmp.lt.u32.totalorder %s1213_s27, %s1510_s1 }
  0x13   : > { %p1389_p12 = pnand %p1512_p9, %p1157_p11 }
  0x15   : > { %p1215_p0 = pneg %p1389_p12 }
  0x17   : > { %p1216_p1 = pnand %p1215_p0, %p1214_p13 }
  0x19   : > { %p1217_p2 = pneg %p1216_p1 }
  0x1b   : > { %p1222_p4 = pnand %p1220_p3, %p1217_p2 }
  0x1d   : > { %1225 = shalt.err (!%p1222_p4)
}
  0x1e   : > { %s1226_s4 = scalar_lea.vmem %s107_s23, 3200  ;;  %p1234_p9 = scmp.lt.s32.totalorder %s107_s23, %s107_s23 }
  0x1f   : > { %p1227_p7 = scmp.ne.s32.totalorder %s107_s23, %s1226_s4  ;;  %p1235_p6 = scmp.lt.s32.totalorder %s1226_s4, %s1226_s4 }
  0x21   : > { %p1229_p8 = pnand %p1227_p7, %p1215_p0  ;;  %p1236_p5 = por %p1235_p6, %p1234_p9 }
  0x23   : > { %p1230_p11 = pneg %p1229_p8 }
  0x25   : > { %p1237_p10 = pnand %p1236_p5, %p1230_p11 }
  0x27   : > { %1240 = shalt.err (!%p1237_p10)
}
  0x28   : > { %s1310_s5 = smov 128   ;;  %s1311_s6 = smov 8  }
  0x29   : > { %1160 = dma.hbm_to_vmem [thread:$0]  (!%p1389_p12), %s1510_s1, 3200, %s107_s23, [#allocation3], %s1310_s5, %s1310_s5, %s1311_s6  }
  0x2a   : > { %p1519_p13 = scmp.ne.s32.totalorder %s1517_s21, 0 }
  0x2b   : > { %p1520_p1 = scmp.eq.s32.totalorder (!%p1519_p13), %s1353_s13, 0 }
  0x2c   : > { %130 = sbr.rel (%p1519_p13) target bundleno = 1894 (0x766), region = 28 }
  0x33   : > { %1286 = dma.done.wait (%p1520_p1), [#allocation3], 3200   ;;  %p1521_p0 = pmov %p1520_p1 }
  0x34   : > { %p152_p5 = scmp.lt.s32.totalorder %s1353_s13, 3  ;;  %vm167_vm0 = vcmask 130048   ;;  %v161_v4 = vld [vmem:[#allocation2] sm:$0xff]  ;;  %v162_v5 = vld [vmem:[#allocation2 + $0x8] sm:$0xff]  ;;  %v164_v10 = vld [vmem:[#allocation2 + $0x18] sm:$0xff]  ;;  %vm460_vm4 = vcmask 261120  }
  0x35   : > { %1288 = vsyncadd (%p1521_p0), [#allocation3], 4294964096  ;;  %v1111_v6 = vpack.c.bf16 %v162_v5, %v161_v4  ;;  %v165_v11 = vld [vmem:[#allocation2 + $0x20] sm:$0xff]  ;;  %v981_v13 = vld [vmem:[#allocation2 + $0x10] ss:$0 sm:$0xff]  ;;  %s1313_s21 = smov 32  }
  0x36   : > { %s153_s14 = scalar_select %p152_p5, %s1353_s13, 3  ;;  %v1115_v12 = vpack.c.bf16 %v165_v11, %v164_v10  ;;  %v984_v50 = vld [vmem:[#allocation2 + $0x28] ss:$0 sm:$0xff]  ;;  %vm1314_vm8 = vmmov 0   ;;  %vm788_vm9 = vcmask 523264  }
  0x37   : > { %1112 = vmatprep.subr.bf16.mxu1 %v1111_v6  ;;  %s149_s23 = sand.u32 1, %s1299_s10   ;;  %s997_s26 = sshll.u32 %s1353_s13, 7 }
  0x38   : > { %s1000_s16 = sshll.u32 %s153_s14, 5  ;;  %1114 = vmatpush3.bf16.msra.mxu1 %v1111_v6  ;;  %s976_s25 = sshll.u32 %s149_s23, 3 }
  0x39   : > { %s156_s24 = scalar_lea.vmem %s1509_s0, %s1000_s16  ;;  %s151_s27 = scalar_lea.vmem [#allocation5], %s976_s25 }
  0x3a   : > { %v159_v0 = vld [vmem:[%s156_s24 + $0x10] sm:$0xff]  ;;  %v160_v1 = vld [vmem:[%s156_s24 + $0x18] sm:$0xff]  ;;  %v157_v2 = vld [vmem:[%s156_s24] sm:$0xff]  ;;  %s899_s28 = sshll.u32 %s151_s27, 4  ;;  %s1467_s3 = scalar_lea.hbm %s1511_s2, %s997_s26  ;;  %s1469_s28 = int_to_ptr.vmem [resolvable:$true] %s899_s28 }
  0x3b   : > { %v1107_v3 = vpack.c.bf16 %v160_v1, %v159_v0  ;;  %1042 = vmatprep.mubr.msk.f32.mxu0 %vm167_vm0, %v157_v2  ;;  %v1421_v7 = vld [vmem:[%s156_s24 + $0x8] sm:$0xff]  ;;  %s886_s4 = scalar_lea.sflag [#allocation4], %s149_s23  ;;  %s1241_s5 = scalar_lea.vmem %s1469_s28, 128 }
  0x3c   : > { %p1242_p6 = scmp.ne.s32.totalorder %s1469_s28, %s1241_s5  ;;  %p1522_p9 = scmp.ne.s32.totalorder %s1515_s19, 0 }
  0x3d   : > { %1108 = vmatprep.subr.bf16.mxu0 %v1107_v3  ;;  %s1316_s13 = smov [#allocation5]  }
  0x3e   : > { %1110 = vmatpush3.bf16.msra.mxu0 %v1107_v3  ;;  %p1243_p10 = pnand %p1242_p6, %p1522_p9  ;;  %s1245_s6 = sshll.u32 %s1316_s13, 4  ;;  %s1246_s6 = int_to_ptr.vmem [resolvable:$false] %s1245_s6 }
  0x3f   : > { %1116 = vmatprep.subr.bf16.mxu0 %v1115_v12  ;;  %s1247_s7 = scalar_lea.vmem %s1246_s6, 256  ;;  %p1248_p2 = scmp.lt.s32.totalorder %s1469_s28, %s1246_s6 }
  0x40   : > { %p1244_p12 = pneg %p1243_p10  ;;  %p1249_p3 = scmp.lt.s32.totalorder %s1247_s7, %s1241_s5 }
  0x41   : > { %1043 = vmatmul.mubr.msk.f32.vlgmr.msra.gmra.mrb[0].mxu0 %vm167_vm0, %v1421_v7 }
  0x42   : > { %1118 = vmatpush3.bf16.msra.mxu0 %v1115_v12  ;;  %p1250_p4 = por %p1249_p3, %p1248_p2 }
  0x44   : > { %p1251_p7 = pnand %p1250_p4, %p1244_p12 }
 0x114   : > { %v1044_v8 = vpop.f32.mrb[0].mxu0 }
 0x115   : > { %v240_v9 = vpop.f32.mrb[1].mxu0 }
 0x116   : > { %1049 = vmatprep.mubr.msk.f32.mxu1 %vm167_vm0, %v240_v9 }
 0x117   : > { %1050 = vmatmul.mubr.msk.f32.vlgmr.msra.gmra.mrb[0].mxu1 %vm167_vm0, %v1044_v8 }
 0x118   : > { %1063 = vmatprep.mubr.msk.f32.mxu1 %vm167_vm0, %v157_v2 }
 0x1ea   : > { %v1051_v14 = vpop.f32.mrb[0].mxu1 }
 0x1eb   : > { %v331_v15 = vadd.f32 %v1051_v14, %v981_v13  ;;  %v325_v16 = vpop.f32.mrb[1].mxu1 }
 0x1ec   : > { %v326_v17 = vadd.f32 %v981_v13, %v325_v16 }
 0x1ed   : > { %vm335_vm1 = vcmp.ge.f32.partialorder %v331_v15, 0.0  ;;  %v337_v18 = vmul.f32 0.01, %v331_v15 }
 0x1ee   : > { %vm334_vm2 = vcmp.ge.f32.partialorder %v326_v17, 0.0  ;;  %v336_v19 = vmul.f32 0.01, %v326_v17 }
 0x1ef   : > { %v339_v20 = vsel %vm335_vm1, %v331_v15, %v337_v18 }
 0x1f0   : > { %v341_v21 = vsel %vm167_vm0, %v339_v20, 0.0  ;;  %v338_v22 = vsel %vm334_vm2, %v326_v17, %v336_v19 }
 0x1f1   : > { %v340_v23 = vsel %vm167_vm0, %v338_v22, 0.0 }
 0x1f2   : > { %v342_v24 = vadd.f32 %v341_v21, %v340_v23  ;;  %v490_v23 = vld [vmem:[#allocation2 + $0x38] sm:$0xff] }
 0x1f4   : > { %v343_v25 = vrot.slane %v342_v24, 4 }
 0x1f6   : > { %v344_v26 = vadd.f32 %v343_v25, %v342_v24 }
 0x1f8   : > { %v345_v27 = vrot.slane %v344_v26, 2 }
 0x1fa   : > { %v346_v28 = vadd.f32 %v345_v27, %v344_v26 }
 0x1fc   : > { %v347_v29 = vrot.slane %v346_v28, 1 }
 0x1fe   : > { %v348_v30 = vadd.f32 %v347_v29, %v346_v28  ;;  %v491_v28 = vld [vmem:[#allocation2 + $0x40] sm:$0xff]  ;;  %v492_v29 = vld [vmem:[#allocation2 + $0x48] sm:$0xff] }
 0x200   : > { %v350_v31 = vmul.f32 0.0625, %v348_v30  ;;  %v1127_v30 = vpack.c.bf16 %v492_v29, %v491_v28  ;;  %v804_v28 = vld [vmem:[#allocation2 + $0xb0] sm:$0xff]  ;;  %v805_v29 = vld [vmem:[#allocation2 + $0xb8] sm:$0xff] }
 0x202   : > { %v351_v32 = vsub.f32 %v338_v22, %v350_v31  ;;  %v352_v33 = vsub.f32 %v339_v20, %v350_v31  ;;  %v489_v22 = vld [vmem:[#allocation2 + $0x30] sm:$0xff] }
 0x203   : > { %v1123_v27 = vpack.c.bf16 %v490_v23, %v489_v22 }
 0x204   : > { %v353_v34 = vmul.f32 %v351_v32, %v351_v32  ;;  %v354_v35 = vmul.f32 %v352_v33, %v352_v33 }
 0x206   : > { %v355_v36 = vsel %vm167_vm0, %v353_v34, 0.0  ;;  %v356_v37 = vsel %vm167_vm0, %v354_v35, 0.0  ;;  %v495_v34 = vld [vmem:[#allocation2 + $0x60] sm:$0xff]  ;;  %v496_v35 = vld [vmem:[#allocation2 + $0x68] sm:$0xff] }
 0x207   : > { %v357_v38 = vadd.f32 %v356_v37, %v355_v36  ;;  %v497_v37 = vld [vmem:[#allocation2 + $0x70] sm:$0xff] }
 0x209   : > { %v358_v39 = vrot.slane %v357_v38, 4 }
 0x20b   : > { %v359_v40 = vadd.f32 %v358_v39, %v357_v38  ;;  %v1135_v38 = vpack.c.bf16 %v497_v37, %v496_v35 }
 0x20d   : > { %v360_v41 = vrot.slane %v359_v40, 2 }
 0x20f   : > { %v361_v42 = vadd.f32 %v360_v41, %v359_v40 }
 0x211   : > { %v362_v43 = vrot.slane %v361_v42, 1 }
 0x213   : > { %v363_v44 = vadd.f32 %v362_v43, %v361_v42 }
 0x215   : > { %v364_v45 = vmul.f32 0.0625, %v363_v44 }
 0x217   : > { %v365_v46 = vadd.f32 1e-05, %v364_v45 }
 0x219   : > { %1207 = vrsqrt.f32 %v365_v46 }
 0x223   : > { %v1208_v47 = vpop.eup %1207 }
 0x224   : > { %v367_v48 = vmul.f32 %v1208_v47, %v351_v32  ;;  %v368_v49 = vmul.f32 %v1208_v47, %v352_v33  ;;  %v494_v33 = vld [vmem:[#allocation2 + $0x58] sm:$0xff] }
 0x225   : > { %v1131_v36 = vpack.c.bf16 %v495_v34, %v494_v33 }
 0x226   : > { %1056 = vmatprep.mubr.msk.f32.mxu0 %vm167_vm0, %v367_v48 }
 0x227   : > { %1057 = vmatmul.mubr.msk.f32.vlgmr.msra.gmra.mrb[2].mxu0 %vm167_vm0, %v368_v49 }
 0x2fa   : > { %v1058_v51 = vpop.f32.mrb[2].mxu0 }
 0x2fb   : > { %v1434_v52 = vadd.f32 %v1058_v51, %v984_v50  ;;  %v445_v53 = vpop.f32.mrb[3].mxu0 }
 0x2fc   : > { %v1436_v54 = vadd.f32 %v984_v50, %v445_v53 }
 0x2fd   : > { %vm455_vm3 = vcmp.ge.f32.partialorder %v1434_v52, 0.0  ;;  %v457_v55 = vmul.f32 0.01, %v1434_v52 }
 0x2fe   : > { %vm454_vm5 = vcmp.ge.f32.partialorder %v1436_v54, 0.0  ;;  %v456_v56 = vmul.f32 0.01, %v1436_v54 }
 0x2ff   : > { %v459_v57 = vsel %vm455_vm3, %v1434_v52, %v457_v55 }
 0x300   : > { %v462_v58 = vsel %vm460_vm4, %v459_v57, 0.0  ;;  %v458_v59 = vsel %vm454_vm5, %v1436_v54, %v456_v56 }
 0x301   : > { %v461_v60 = vsel %vm460_vm4, %v458_v59, 0.0 }
 0x302   : > { %v463_v61 = vadd.f32 %v462_v58, %v461_v60 }
 0x304   : > { %v464_v62 = vrot.slane %v463_v61, 4 }
 0x306   : > { %v465_v63 = vadd.f32 %v464_v62, %v463_v61 }
 0x308   : > { %v466_v0 = vrot.slane %v465_v63, 2 }
 0x30a   : > { %v467_v1 = vadd.f32 %v466_v0, %v465_v63 }
 0x30c   : > { %v468_v2 = vrot.slane %v467_v1, 1 }
 0x30e   : > { %v469_v3 = vadd.f32 %v468_v2, %v467_v1 }
 0x310   : > { %v470_v4 = vmul.f32 0.0625, %v469_v3 }
 0x312   : > { %v471_v5 = vsub.f32 %v458_v59, %v470_v4  ;;  %v472_v6 = vsub.f32 %v459_v57, %v470_v4 }
 0x314   : > { %v473_v8 = vmul.f32 %v471_v5, %v471_v5  ;;  %v474_v9 = vmul.f32 %v472_v6, %v472_v6 }
 0x316   : > { %v475_v10 = vsel %vm460_vm4, %v473_v8, 0.0  ;;  %v476_v11 = vsel %vm460_vm4, %v474_v9, 0.0 }
 0x317   : > { %v477_v12 = vadd.f32 %v476_v11, %v475_v10 }
 0x319   : > { %v478_v13 = vrot.slane %v477_v12, 4 }
 0x31b   : > { %v479_v14 = vadd.f32 %v478_v13, %v477_v12 }
 0x31d   : > { %v480_v15 = vrot.slane %v479_v14, 2 }
 0x31f   : > { %v481_v16 = vadd.f32 %v480_v15, %v479_v14  ;;  %v798_v14 = vld [vmem:[#allocation2 + $0x80] sm:$0xff]  ;;  %v799_v15 = vld [vmem:[#allocation2 + $0x88] sm:$0xff] }
 0x321   : > { %v482_v17 = vrot.slane %v481_v16, 1 }
 0x323   : > { %v483_v18 = vadd.f32 %v482_v17, %v481_v16  ;;  %v1140_v16 = vpack.c.bf16 %v799_v15, %v798_v14  ;;  %v1312_v17 = vmov 0.0|0.0  }
 0x324   : > { %1139 = vmatprep.subr.bf16.mxu0 %v1312_v17 }
 0x325   : > { %v484_v19 = vmul.f32 0.0625, %v483_v18  ;;  %1141 = vmatpush3.bf16.msra.mxu0 %v1140_v16  ;;  %v800_v18 = vld [vmem:[#allocation2 + $0x90] sm:$0xff] }
 0x326   : > { %1142 = vmatprep.subr.bf16.mxu0 %v1312_v17 }
 0x327   : > { %v485_v20 = vadd.f32 1e-05, %v484_v19  ;;  %v801_v19 = vld [vmem:[#allocation2 + $0x98] sm:$0xff] }
 0x329   : > { %1209 = vrsqrt.f32 %v485_v20  ;;  %v1143_v20 = vpack.c.bf16 %v801_v19, %v800_v18 }
 0x32b   : > { %1144 = vmatpush3.bf16.msra.mxu0 %v1143_v20 }
 0x32c   : > { %1145 = vmatprep.subr.bf16.mxu0 %v1312_v17 }
 0x333   : > { %v1210_v21 = vpop.eup %1209 }
 0x334   : > { %v487_v24 = vmul.f32 %v1210_v21, %v471_v5  ;;  %v488_v25 = vmul.f32 %v1210_v21, %v472_v6  ;;  %v992_v21 = vld [vmem:[#allocation2 + $0x78] ss:$0 sm:$0xff] }
 0x336   : > { %v1119_v26 = vpack.c.bf16 %v488_v25, %v487_v24  ;;  %v802_v24 = vld [vmem:[#allocation2 + $0xa0] sm:$0xff]  ;;  %v803_v25 = vld [vmem:[#allocation2 + $0xa8] sm:$0xff] }
 0x338   : > { %1120 = vmatprep.subr.bf16.mxu1 %v1119_v26 }
 0x339   : > { %1122 = vmatpush3.bf16.msra.mxu1 %v1119_v26 }
 0x33a   : > { %1124 = vmatprep.subr.bf16.mxu1 %v1123_v27 }
 0x33c   : > { %1064 = vmatmul.mubr.msk.f32.vlgmr.msra.gmra.mrb[2].mxu1 %vm167_vm0, %v1421_v7  ;;  %v989_v7 = vld [vmem:[#allocation2 + $0x50] ss:$0 sm:$0xff] }
 0x33d   : > { %1126 = vmatpush3.bf16.msra.mxu1 %v1123_v27  ;;  %v1146_v27 = vpack.c.bf16 %v803_v25, %v802_v24 }
 0x33e   : > { %1128 = vmatprep.subr.bf16.mxu1 %v1127_v30 }
 0x33f   : > { %1147 = vmatpush3.bf16.msra.mxu0 %v1146_v27 }
 0x340   : > { %1148 = vmatprep.subr.bf16.mxu0 %v1312_v17 }
 0x341   : > { %1130 = vmatpush3.bf16.msra.mxu1 %v1127_v30 }
 0x342   : > { %1132 = vmatprep.subr.bf16.mxu1 %v1131_v36 }
 0x40f   : > { %v1065_v31 = vpop.f32.mrb[2].mxu1 }
 0x410   : > { %v565_v32 = vpop.f32.mrb[3].mxu1 }
 0x411   : > { %1074 = vmatprep.mubr.msk.f32.mxu1 %vm460_vm4, %v565_v32  ;;  %v1315_v32 = vmov 0.0  }
 0x412   : > { %1075 = vmatmul.mubr.msk.f32.vlgmr.msra.gmra.mrb[4].mxu1 %vm460_vm4, %v1065_v31  ;;  %v1149_v31 = vpack.c.bf16 %v805_v29, %v804_v28  ;;  %1104 = vmatprep.mubr.msk.f32.mxu0 %vm1314_vm8, %v1315_v32 }
 0x413   : > { %1134 = vmatpush3.bf16.msra.mxu1 %v1131_v36 }
 0x414   : > { %1136 = vmatprep.subr.bf16.mxu1 %v1135_v38  ;;  %1150 = vmatpush3.bf16.msra.mxu0 %v1149_v31 }
 0x417   : > { %1138 = vmatpush3.bf16.msra.mxu1 %v1135_v38 }
 0x4e5   : > { %v1076_v39 = vpop.f32.mrb[4].mxu1 }
 0x4e6   : > { %v656_v40 = vadd.f32 %v1076_v39, %v989_v7  ;;  %v650_v41 = vpop.f32.mrb[5].mxu1 }
 0x4e7   : > { %v651_v42 = vadd.f32 %v989_v7, %v650_v41 }
 0x4e8   : > { %vm660_vm6 = vcmp.ge.f32.partialorder %v656_v40, 0.0  ;;  %v662_v43 = vmul.f32 0.01, %v656_v40 }
 0x4e9   : > { %vm659_vm7 = vcmp.ge.f32.partialorder %v651_v42, 0.0  ;;  %v661_v44 = vmul.f32 0.01, %v651_v42 }
 0x4ea   : > { %v664_v45 = vsel %vm660_vm6, %v656_v40, %v662_v43 }
 0x4eb   : > { %v666_v46 = vsel %vm460_vm4, %v664_v45, 0.0  ;;  %v663_v47 = vsel %vm659_vm7, %v651_v42, %v661_v44 }
 0x4ec   : > { %v665_v48 = vsel %vm460_vm4, %v663_v47, 0.0 }
 0x4ed   : > { %v667_v49 = vadd.f32 %v666_v46, %v665_v48 }
 0x4ef   : > { %v668_v50 = vrot.slane %v667_v49, 4 }
 0x4f1   : > { %v669_v51 = vadd.f32 %v668_v50, %v667_v49 }
 0x4f3   : > { %v670_v53 = vrot.slane %v669_v51, 2 }
 0x4f5   : > { %v671_v55 = vadd.f32 %v670_v53, %v669_v51 }
 0x4f7   : > { %v672_v56 = vrot.slane %v671_v55, 1 }
 0x4f9   : > { %v673_v57 = vadd.f32 %v672_v56, %v671_v55 }
 0x4fb   : > { %v674_v58 = vmul.f32 0.0625, %v673_v57 }
 0x4fd   : > { %v675_v59 = vsub.f32 %v663_v47, %v674_v58  ;;  %v676_v60 = vsub.f32 %v664_v45, %v674_v58  ;;  %v880_v45 = vlaneseq }
 0x4ff   : > { %v677_v61 = vmul.f32 %v675_v59, %v675_v59  ;;  %v678_v62 = vmul.f32 %v676_v60, %v676_v60  ;;  %v881_v46 = vshrl.u32 %v880_v45, 7 }
 0x501   : > { %v679_v63 = vsel %vm460_vm4, %v677_v61, 0.0  ;;  %v680_v0 = vsel %vm460_vm4, %v678_v62, 0.0  ;;  %v882_v47 = vsub.s32 0, %v881_v46 }
 0x502   : > { %v681_v1 = vadd.f32 %v680_v0, %v679_v63 }
 0x504   : > { %v682_v2 = vrot.slane %v681_v1, 4 }
 0x506   : > { %v683_v3 = vadd.f32 %v682_v2, %v681_v1 }
 0x508   : > { %v684_v4 = vrot.slane %v683_v3, 2 }
 0x50a   : > { %v685_v5 = vadd.f32 %v684_v4, %v683_v3 }
 0x50c   : > { %v686_v6 = vrot.slane %v685_v5, 1 }
 0x50e   : > { %v687_v8 = vadd.f32 %v686_v6, %v685_v5 }
 0x510   : > { %v688_v9 = vmul.f32 0.0625, %v687_v8 }
 0x512   : > { %v689_v10 = vadd.f32 1e-05, %v688_v9 }
 0x514   : > { %1211 = vrsqrt.f32 %v689_v10 }
 0x51e   : > { %v1212_v11 = vpop.eup %1211 }
 0x51f   : > { %v691_v12 = vmul.f32 %v1212_v11, %v675_v59  ;;  %v692_v13 = vmul.f32 %v1212_v11, %v676_v60 }
 0x521   : > { %1085 = vmatprep.mubr.msk.f32.mxu1 %vm460_vm4, %v691_v12 }
 0x522   : > { %1086 = vmatmul.mubr.msk.f32.vlgmr.msra.gmra.mrb[6].mxu1 %vm460_vm4, %v692_v13 }
 0x5f5   : > { %v1087_v22 = vpop.f32.mrb[6].mxu1 }
 0x5f6   : > { %v769_v23 = vpop.f32.mrb[7].mxu1  ;;  %v775_v30 = vadd.f32 %v1087_v22, %v992_v21 }
 0x5f7   : > { %v770_v26 = vadd.f32 %v992_v21, %v769_v23 }
 0x5f9   : > { %780 = vrot.lane.b32.xlu0 %v770_v26, %s1313_s21 }
 0x5fd   : > { %782 = vrot.lane.b32.xlu0 %v775_v30, %s1313_s21 }
 0x66b   : > { %v781_v33 = vpop.permute.xlu0 %780 }
 0x66c   : > { %v786_v34 = vsel %vm460_vm4, %v1436_v54, %v781_v33  ;;  %v806_v54 = vld [vmem:[#allocation2 + $0xc0] sm:$0x1] }
 0x66d   : > { %v789_v37 = vsel %vm788_vm9, %v786_v34, 0.0 }
 0x66f   : > { %v783_v35 = vpop.permute.xlu0 %782 }
 0x670   : > { %v787_v36 = vsel %vm460_vm4, %v1434_v52, %v783_v35 }
 0x671   : > { %v790_v38 = vsel %vm788_vm9, %v787_v36, 0.0 }
 0x672   : > { %v791_v7 = vadd.f32 %v790_v38, %v789_v37 }
 0x674   : > { %v792_v39 = vrot.slane %v791_v7, 4 }
 0x676   : > { %v793_v40 = vadd.f32 %v792_v39, %v791_v7 }
 0x678   : > { %v794_v41 = vrot.slane %v793_v40, 2 }
 0x67a   : > { %v795_v42 = vadd.f32 %v794_v41, %v793_v40 }
 0x67c   : > { %v796_v43 = vrot.slane %v795_v42, 1 }
 0x67e   : > { %v797_v44 = vadd.f32 %v796_v43, %v795_v42 }
 0x680   : > { %1105 = vmatmul.mubr.msk.f32.vlgmr.msra.gmra.mrb[4].mxu0 %vm788_vm9, %v797_v44 }
 0x753   : > { %v876_v48 = vpop.f32.mrb[4].mxu0 }
 0x754   : > { %v877_v52 = vadd.f32 %v876_v48, %v806_v54  ;;  %v1106_v49 = vpop.f32.mrb[5].mxu0 }
 0x756   : > { %v883_v50 = vrot.slane %v877_v52, %v882_v47 }
 0x758   : > { %884 = vst [vmem:[%s151_s27] sm:$0xff] %v883_v50 }
 0x759   : > { %1254 = shalt.err (!%p1251_p7)
}
 0x75a   : > { %s1255_s8 = scalar_lea.hbm %s1467_s3, 128  ;;  %s1259_s17 = scalar_lea.hbm %s1511_s2, 512 }
 0x75b   : > { %p1256_p8 = scmp.ne.s32.totalorder %s1467_s3, %s1255_s8  ;;  %p1260_p1 = scmp.lt.u32.totalorder %s1467_s3, %s1511_s2 }
 0x75c   : > { %p1261_p0 = scmp.lt.u32.totalorder %s1259_s17, %s1255_s8  ;;  %p1263_p6 = scmp.lt.u32.totalorder %s1255_s8, %s1467_s3 }
 0x75d   : > { %p1257_p11 = pnand %p1256_p8, %p1522_p9 }
 0x75e   : > { %p1262_p5 = por %p1261_p0, %p1260_p1 }
 0x75f   : > { %p1258_p13 = pneg %p1257_p11 }
 0x760   : > { %p1264_p10 = por %p1263_p6, %p1262_p5 }
 0x762   : > { %p1265_p12 = pnand %p1264_p10, %p1258_p13 }
 0x764   : > { %1268 = shalt.err (!%p1265_p12)
}
 0x765   : > { %1155 = dma.vmem_to_hbm [thread:$0]  (%p1522_p9), %s1469_s28, 128, %s1467_s3, %s886_s4  }
 0x766 PF: > { %p1167_p2 = scmp.ge.s32.totalorder %s1307_s12, 2  ;;  %s911_s21 = sand.u32 1, %s1295_s9  }
 0x767   : > { %p1523_p3 = scmp.ne.s32.totalorder %s1516_s20, 0  ;;  %s912_s23 = scalar_lea.sflag [#allocation4], %s911_s21 }
 0x769   : > { %p1162_p4 = pnand %p1167_p2, %p1523_p3 }
 0x76b   : > { %1290 = dma.done.wait (!%p1162_p4), %s912_s23, 128  }
 0x76c   : > { %1292 = vsyncadd (!%p1162_p4), %s912_s23, 4294967168  ;;  %p13_p7 = scmp.ge.s32.totalorder %s1357_s15, 6   ;;  %s1524_s9 = smov %s1299_s10 }
 0x76d   : > { %s1525_s10 = smov %s1303_s11  ;;  %s1526_s11 = smov %s1368_s18 }
 0x76e   : > { %s1527_s12 = smov %s1357_s15  ;;  %15 = sbr.rel (!%p13_p7) target bundleno = 4 (0x4), region = 68 }
 0x775   :  { %917 = vsyncpa [#allocation3], 1 }
 0x776   :  { %919 = vsyncpa [#allocation3 + $0x1], 1 }
 0x777   :  { %920 = vsyncpa [#allocation4], 1 }
 0x778   :  { %922 = vsyncpa [#allocation4 + $0x1], 1 }

</bundles_post_ra>
